<compile_context>
chip_gen: v5e
topology: v5e:2x2
jax: 0.10.0
libtpu: 0.0.40
codegen_flags: <defaults>
</compile_context>

<pallas_src>
import functools
import numpy as np
import jax
import jax.numpy as jnp
from jax.experimental import pallas as pl
from jax.experimental.pallas import tpu as pltpu


def _round_up(v, m):
    return -(-v // m) * m


def _round_down(v, m):
    return (v // m) * m


# ----------------------------------------------------------------------------
# Pallas kernel: per M-tile, accumulate kh*kw shifted-window GEMMs + bias.
# ----------------------------------------------------------------------------
def _ctc_gemm_kernel(w_ref, b_ref, xa_ref, xh_ref, o_ref, *, tap_bases, tm):
    # w_ref : (kh*kw, 2Cout, 2Cin)  resident combined complex weights (per tap)
    # b_ref : (2Cout, 1)            resident combined bias
    # xa_ref: (2Cin, TM)            current flattened-input tile
    # xh_ref: (2Cin, HALO_B)        right halo (first columns of the next tile)
    # o_ref : (2Cout, TM)           output tile (lane-dense in M)
    x_full = jnp.concatenate([xa_ref[...], xh_ref[...]], axis=1)  # (2Cin, TM+HALO_B)
    acc = None
    for t, base in enumerate(tap_bases):
        xwin = x_full[:, base:base + tm]                          # element-offset window
        part = jnp.dot(w_ref[t], xwin, preferred_element_type=jnp.float32)
        acc = part if acc is None else acc + part
    o_ref[...] = (acc + b_ref[...]).astype(o_ref.dtype)


# ----------------------------------------------------------------------------
# Wrapper: ComplexConvTranspose2d forward (complex_axis=1, groups=1)
# ----------------------------------------------------------------------------
def complex_conv_transpose2d(x, w_real, w_imag, b_real, b_imag,
                             stride, padding, output_padding, *, tm=1024):
    """x: (N, 2*Cin, H, W) NCHW (real channels first, then imag).
       w_*: (Cin, Cout, kH, kW) PyTorch ConvTranspose2d weight layout.
       Returns (N, 2*Cout, H_out, W_out)."""
    n, c2, h, w_in = x.shape
    cin = c2 // 2
    _, cout, kh, kw = w_real.shape
    co2 = 2 * cout
    sh, sw = stride
    ph, pw = padding
    oph, opw = output_padding

    h_out = (h - 1) * sh - 2 * ph + kh + oph
    w_out = (w_in - 1) * sw - 2 * pw + kw + opw
    assert kh - 1 - ph >= 0 and kw - 1 - pw >= 0, "padding > kernel-1 unsupported"

    # --- weight packing: transposed-conv -> stride-1 conv (flipped), fused ------
    def to_hwio_flipped(wt):
        # (Cin, Cout, kH, kW) -> spatial flip -> (kH, kW, Cin, Cout)
        return jnp.transpose(wt[:, :, ::-1, ::-1], (2, 3, 0, 1))

    wr = to_hwio_flipped(w_real)
    wi = to_hwio_flipped(w_imag)
    # combined complex weight: input blocks [real; imag] x output blocks [real; imag]
    w_top = jnp.concatenate([wr, wi], axis=3)     # real-input rows:  [ Wr | Wi]
    w_bot = jnp.concatenate([-wi, wr], axis=3)    # imag-input rows:  [-Wi | Wr]
    w_comb = jnp.concatenate([w_top, w_bot], axis=2)          # (kH, kW, 2Cin, 2Cout)
    # per-tap (2Cout, 2Cin) matrices, tap order = (kh, kw) row-major
    w_taps = jnp.transpose(w_comb, (0, 1, 3, 2)).reshape(kh * kw, co2, c2)
    b_comb = jnp.concatenate([b_real - b_imag, b_real + b_imag]).reshape(co2, 1)

    # --- activation glue: channels-first, dilate by stride + pad (one scatter) --
    ph0, pw0 = kh - 1 - ph, kw - 1 - pw
    hd, wd = (h - 1) * sh + 1, (w_in - 1) * sw + 1
    hp, wp = hd + 2 * ph0 + oph, wd + 2 * pw0 + opw
    assert hp - kh + 1 == h_out and wp - kw + 1 == w_out
    x_cf = jnp.transpose(x, (1, 0, 2, 3))                       # (2Cin, N, H, W)
    x_big = jnp.zeros((c2, n, hp, wp), x.dtype)
    x_big = x_big.at[:, :, ph0:ph0 + hd:sh, pw0:pw0 + wd:sw].set(x_cf)

    # --- flattened layout + tile-size selection --------------------------------
    m_total = n * hp * wp
    halo = (kh - 1) * wp + (kw - 1)                     # max tap shift (elements)
    halo_b = max(128, _round_up(max(halo, 1), 128))     # 128-aligned halo block
    bytesz = jnp.dtype(x.dtype).itemsize
    per_col = (4 * c2 + 3 * co2) * bytesz               # VMEM bytes per M column
    budget = 12 << 20
    tm_budget = max(halo_b, _round_down(max(budget // per_col, halo_b), halo_b))
    tm_eff = max(halo_b, _round_down(max(tm, halo_b), halo_b))
    tm_eff = min(tm_eff, tm_budget)

    grid_m = pl.cdiv(m_total, tm_eff)
    m_pad = grid_m * tm_eff
    m_cols = m_pad + halo_b                             # room for last tile's halo

    x_flat = x_big.reshape(c2, m_total)
    x_flat = jnp.pad(x_flat, ((0, 0), (0, m_cols - m_total)))

    blocks_per_tile = tm_eff // halo_b
    tap_bases = tuple(kh_i * wp + kw_i for kh_i in range(kh) for kw_i in range(kw))
    kernel = functools.partial(_ctc_gemm_kernel, tap_bases=tap_bases, tm=tm_eff)

    vmem_needed = ((4 * c2 + 3 * co2) * tm_eff + 3 * c2 * halo_b
                   + 2 * kh * kw * co2 * c2 + 2 * co2) * bytesz
    vmem_limit = int(min(max(2 * vmem_needed, 8 << 20), 32 << 20))

    cost = pl.CostEstimate(
        flops=2 * m_pad * (kh * kw * c2) * co2,
        transcendentals=0,
        bytes_accessed=(c2 * (m_pad + grid_m * halo_b) + co2 * m_pad
                        + kh * kw * co2 * c2 + co2) * bytesz)

    out_flat = pl.pallas_call(
        kernel,
        out_shape=jax.ShapeDtypeStruct((co2, m_pad), x.dtype),
        grid=(grid_m,),
        in_specs=[
            pl.BlockSpec((kh * kw, co2, c2), lambda i: (0, 0, 0)),  # weights: resident
            pl.BlockSpec((co2, 1), lambda i: (0, 0)),               # bias:    resident
            pl.BlockSpec((c2, tm_eff), lambda i: (0, i)),           # activation tile
            pl.BlockSpec((c2, halo_b),                              # right halo block
                         lambda i: (0, (i + 1) * blocks_per_tile)),
        ],
        out_specs=pl.BlockSpec((co2, tm_eff), lambda i: (0, i)),
        compiler_params=pltpu.CompilerParams(
            dimension_semantics=("parallel",),
            vmem_limit_bytes=vmem_limit),
        cost_estimate=cost,
    )(w_taps, b_comb, x_flat, x_flat)

    # strip garbage fringe columns/rows, back to NCHW
    out = out_flat[:, :m_total].reshape(co2, n, hp, wp)[:, :, :h_out, :w_out]
    return jnp.transpose(out, (1, 0, 2, 3))            # (N, 2Cout, Ho, Wo)


# ----------------------------------------------------------------------------
# Pure-JAX reference (mirrors the PyTorch forward) for verification
# ----------------------------------------------------------------------------
def _conv_transpose2d_ref(x, wt, b, stride, padding, output_padding):
    kh, kw = wt.shape[2], wt.shape[3]
    ph, pw = padding
    oph, opw = output_padding
    rhs = jnp.transpose(wt[:, :, ::-1, ::-1], (1, 0, 2, 3))   # (Cout, Cin, kH, kW)
    out = jax.lax.conv_general_dilated(
        x, rhs, window_strides=(1, 1),
        padding=[(kh - 1 - ph, kh - 1 - ph + oph),
                 (kw - 1 - pw, kw - 1 - pw + opw)],
        lhs_dilation=stride,
        dimension_numbers=("NCHW", "OIHW", "NCHW"),
        precision=jax.lax.Precision.HIGHEST)
    return out + b[None, :, None, None]


def complex_conv_transpose2d_ref(x, w_real, w_imag, b_real, b_imag,
                                 stride, padding, output_padding):
    real, imag = jnp.split(x, 2, axis=1)
    r2r = _conv_transpose2d_ref(real, w_real, b_real, stride, padding, output_padding)
    i2i = _conv_transpose2d_ref(imag, w_imag, b_imag, stride, padding, output_padding)
    r2i = _conv_transpose2d_ref(real, w_imag, b_imag, stride, padding, output_padding)
    i2r = _conv_transpose2d_ref(imag, w_real, b_real, stride, padding, output_padding)
    return jnp.concatenate([r2r - i2i, r2i + i2r], axis=1)


# ----------------------------------------------------------------------------
if __name__ == "__main__":
    key = jax.random.PRNGKey(0)
    N, C_IN, C_OUT = 2, 8, 8          # in/out channels are real+imag (so 4 each)
    H, W = 16, 16
    KH, KW = 3, 3
    STRIDE, PAD, OUT_PAD = (2, 2), (1, 1), (1, 1)
    cin, cout = C_IN // 2, C_OUT // 2

    kx, kr, ki, kbr, kbi = jax.random.split(key, 5)
    x = jax.random.normal(kx, (N, C_IN, H, W), jnp.float32)
    # parameter init matching the module (normal std=0.05); non-zero biases so
    # the fused bias path is actually exercised.
    w_real = 0.05 * jax.random.normal(kr, (cin, cout, KH, KW), jnp.float32)
    w_imag = 0.05 * jax.random.normal(ki, (cin, cout, KH, KW), jnp.float32)
    b_real = 0.1 * jax.random.normal(kbr, (cout,), jnp.float32)
    b_imag = 0.1 * jax.random.normal(kbi, (cout,), jnp.float32)

    # tm=256 so the small test exercises a multi-step pipelined grid (incl. halo).
    out = complex_conv_transpose2d(x, w_real, w_imag, b_real, b_imag,
                                   STRIDE, PAD, OUT_PAD, tm=256)
    out = jax.block_until_ready(out)

    ref = complex_conv_transpose2d_ref(x, w_real, w_imag, b_real, b_imag,
                                       STRIDE, PAD, OUT_PAD)
    assert out.shape == ref.shape, (out.shape, ref.shape)
    # Kernel uses default MXU precision with f32 accumulation; reference uses
    # HIGHEST, so allow a slightly looser tolerance.
    np.testing.assert_allclose(np.asarray(out), np.asarray(ref),
                               rtol=1e-2, atol=1e-2)
    print("KERNEL_OK")
</pallas_src>

<mosaic_0001>
module attributes {stable_mosaic.version = 11 : i64} {
  func.func @_ctc_gemm_kernel(%arg0: i32, %arg1: memref<9x8x8xf32, #tpu.memory_space<vmem>>, %arg2: memref<8x1xf32, #tpu.memory_space<vmem>>, %arg3: memref<8x256xf32, #tpu.memory_space<vmem>>, %arg4: memref<8x128xf32, #tpu.memory_space<vmem>>, %arg5: memref<8x256xf32, #tpu.memory_space<vmem>>) attributes {dimension_semantics = [#tpu.dimension_semantics<parallel>], iteration_bounds = array<i64: 10>, scalar_prefetch = 0 : i64, scratch_operands = 0 : i64, tpu.core_type = #tpu.core_type<tc>, window_params = [{pipeline_mode = #tpu.pipeline_mode<synchronous>, transform_indices = @transform_0, window_bounds = array<i64: 9, 8, 8>}, {pipeline_mode = #tpu.pipeline_mode<synchronous>, transform_indices = @transform_1, window_bounds = array<i64: 8, 1>}, {transform_indices = @transform_2, window_bounds = array<i64: 8, 256>}, {transform_indices = @transform_3, window_bounds = array<i64: 8, 128>}, {transform_indices = @transform_4, window_bounds = array<i64: 8, 256>}]} {
    %c0 = arith.constant 0 : index
    %c0_0 = arith.constant 0 : index
    %0 = vector.load %arg3[%c0, %c0_0] : memref<8x256xf32, #tpu.memory_space<vmem>>, vector<8x256xf32>
    %c0_1 = arith.constant 0 : index
    %c0_2 = arith.constant 0 : index
    %1 = vector.load %arg4[%c0_1, %c0_2] : memref<8x128xf32, #tpu.memory_space<vmem>>, vector<8x128xf32>
    %2 = tpu.concatenate %0, %1 in 1 : vector<8x256xf32>, vector<8x128xf32> -> vector<8x384xf32>
    %3 = vector.extract_strided_slice %2 {offsets = [0, 0], sizes = [8, 256], strides = [1, 1]} : vector<8x384xf32> to vector<8x256xf32>
    %c0_3 = arith.constant 0 : index
    %c0_4 = arith.constant 0 : index
    %c0_5 = arith.constant 0 : index
    %4 = vector.load %arg1[%c0_3, %c0_4, %c0_5] : memref<9x8x8xf32, #tpu.memory_space<vmem>>, vector<1x8x8xf32>
    %5 = vector.shape_cast %4 : vector<1x8x8xf32> to vector<8x8xf32>
    %cst = arith.constant dense<0.000000e+00> : vector<8x256xf32>
    %6 = tpu.matmul %5, %3, %cst {dimension_numbers = #tpu.dot_dimension_numbers<[1], [0], [0], [1], [0, 0, 1, 1], [], []>} : vector<8x8xf32>, vector<8x256xf32>, vector<8x256xf32> -> vector<8x256xf32>
    %7 = vector.extract_strided_slice %2 {offsets = [0, 1], sizes = [8, 256], strides = [1, 1]} : vector<8x384xf32> to vector<8x256xf32>
    %c1 = arith.constant 1 : index
    %c0_6 = arith.constant 0 : index
    %c0_7 = arith.constant 0 : index
    %8 = vector.load %arg1[%c1, %c0_6, %c0_7] : memref<9x8x8xf32, #tpu.memory_space<vmem>>, vector<1x8x8xf32>
    %9 = vector.shape_cast %8 : vector<1x8x8xf32> to vector<8x8xf32>
    %cst_8 = arith.constant dense<0.000000e+00> : vector<8x256xf32>
    %10 = tpu.matmul %9, %7, %cst_8 {dimension_numbers = #tpu.dot_dimension_numbers<[1], [0], [0], [1], [0, 0, 1, 1], [], []>} : vector<8x8xf32>, vector<8x256xf32>, vector<8x256xf32> -> vector<8x256xf32>
    %11 = arith.addf %6, %10 : vector<8x256xf32>
    %12 = vector.extract_strided_slice %2 {offsets = [0, 2], sizes = [8, 256], strides = [1, 1]} : vector<8x384xf32> to vector<8x256xf32>
    %c2 = arith.constant 2 : index
    %c0_9 = arith.constant 0 : index
    %c0_10 = arith.constant 0 : index
    %13 = vector.load %arg1[%c2, %c0_9, %c0_10] : memref<9x8x8xf32, #tpu.memory_space<vmem>>, vector<1x8x8xf32>
    %14 = vector.shape_cast %13 : vector<1x8x8xf32> to vector<8x8xf32>
    %cst_11 = arith.constant dense<0.000000e+00> : vector<8x256xf32>
    %15 = tpu.matmul %14, %12, %cst_11 {dimension_numbers = #tpu.dot_dimension_numbers<[1], [0], [0], [1], [0, 0, 1, 1], [], []>} : vector<8x8xf32>, vector<8x256xf32>, vector<8x256xf32> -> vector<8x256xf32>
    %16 = arith.addf %11, %15 : vector<8x256xf32>
    %17 = vector.extract_strided_slice %2 {offsets = [0, 34], sizes = [8, 256], strides = [1, 1]} : vector<8x384xf32> to vector<8x256xf32>
    %c3 = arith.constant 3 : index
    %c0_12 = arith.constant 0 : index
    %c0_13 = arith.constant 0 : index
    %18 = vector.load %arg1[%c3, %c0_12, %c0_13] : memref<9x8x8xf32, #tpu.memory_space<vmem>>, vector<1x8x8xf32>
    %19 = vector.shape_cast %18 : vector<1x8x8xf32> to vector<8x8xf32>
    %cst_14 = arith.constant dense<0.000000e+00> : vector<8x256xf32>
    %20 = tpu.matmul %19, %17, %cst_14 {dimension_numbers = #tpu.dot_dimension_numbers<[1], [0], [0], [1], [0, 0, 1, 1], [], []>} : vector<8x8xf32>, vector<8x256xf32>, vector<8x256xf32> -> vector<8x256xf32>
    %21 = arith.addf %16, %20 : vector<8x256xf32>
    %22 = vector.extract_strided_slice %2 {offsets = [0, 35], sizes = [8, 256], strides = [1, 1]} : vector<8x384xf32> to vector<8x256xf32>
    %c4 = arith.constant 4 : index
    %c0_15 = arith.constant 0 : index
    %c0_16 = arith.constant 0 : index
    %23 = vector.load %arg1[%c4, %c0_15, %c0_16] : memref<9x8x8xf32, #tpu.memory_space<vmem>>, vector<1x8x8xf32>
    %24 = vector.shape_cast %23 : vector<1x8x8xf32> to vector<8x8xf32>
    %cst_17 = arith.constant dense<0.000000e+00> : vector<8x256xf32>
    %25 = tpu.matmul %24, %22, %cst_17 {dimension_numbers = #tpu.dot_dimension_numbers<[1], [0], [0], [1], [0, 0, 1, 1], [], []>} : vector<8x8xf32>, vector<8x256xf32>, vector<8x256xf32> -> vector<8x256xf32>
    %26 = arith.addf %21, %25 : vector<8x256xf32>
    %27 = vector.extract_strided_slice %2 {offsets = [0, 36], sizes = [8, 256], strides = [1, 1]} : vector<8x384xf32> to vector<8x256xf32>
    %c5 = arith.constant 5 : index
    %c0_18 = arith.constant 0 : index
    %c0_19 = arith.constant 0 : index
    %28 = vector.load %arg1[%c5, %c0_18, %c0_19] : memref<9x8x8xf32, #tpu.memory_space<vmem>>, vector<1x8x8xf32>
    %29 = vector.shape_cast %28 : vector<1x8x8xf32> to vector<8x8xf32>
    %cst_20 = arith.constant dense<0.000000e+00> : vector<8x256xf32>
    %30 = tpu.matmul %29, %27, %cst_20 {dimension_numbers = #tpu.dot_dimension_numbers<[1], [0], [0], [1], [0, 0, 1, 1], [], []>} : vector<8x8xf32>, vector<8x256xf32>, vector<8x256xf32> -> vector<8x256xf32>
    %31 = arith.addf %26, %30 : vector<8x256xf32>
    %32 = vector.extract_strided_slice %2 {offsets = [0, 68], sizes = [8, 256], strides = [1, 1]} : vector<8x384xf32> to vector<8x256xf32>
    %c6 = arith.constant 6 : index
    %c0_21 = arith.constant 0 : index
    %c0_22 = arith.constant 0 : index
    %33 = vector.load %arg1[%c6, %c0_21, %c0_22] : memref<9x8x8xf32, #tpu.memory_space<vmem>>, vector<1x8x8xf32>
    %34 = vector.shape_cast %33 : vector<1x8x8xf32> to vector<8x8xf32>
    %cst_23 = arith.constant dense<0.000000e+00> : vector<8x256xf32>
    %35 = tpu.matmul %34, %32, %cst_23 {dimension_numbers = #tpu.dot_dimension_numbers<[1], [0], [0], [1], [0, 0, 1, 1], [], []>} : vector<8x8xf32>, vector<8x256xf32>, vector<8x256xf32> -> vector<8x256xf32>
    %36 = arith.addf %31, %35 : vector<8x256xf32>
    %37 = vector.extract_strided_slice %2 {offsets = [0, 69], sizes = [8, 256], strides = [1, 1]} : vector<8x384xf32> to vector<8x256xf32>
    %c7 = arith.constant 7 : index
    %c0_24 = arith.constant 0 : index
    %c0_25 = arith.constant 0 : index
    %38 = vector.load %arg1[%c7, %c0_24, %c0_25] : memref<9x8x8xf32, #tpu.memory_space<vmem>>, vector<1x8x8xf32>
    %39 = vector.shape_cast %38 : vector<1x8x8xf32> to vector<8x8xf32>
    %cst_26 = arith.constant dense<0.000000e+00> : vector<8x256xf32>
    %40 = tpu.matmul %39, %37, %cst_26 {dimension_numbers = #tpu.dot_dimension_numbers<[1], [0], [0], [1], [0, 0, 1, 1], [], []>} : vector<8x8xf32>, vector<8x256xf32>, vector<8x256xf32> -> vector<8x256xf32>
    %41 = arith.addf %36, %40 : vector<8x256xf32>
    %42 = vector.extract_strided_slice %2 {offsets = [0, 70], sizes = [8, 256], strides = [1, 1]} : vector<8x384xf32> to vector<8x256xf32>
    %c8 = arith.constant 8 : index
    %c0_27 = arith.constant 0 : index
    %c0_28 = arith.constant 0 : index
    %43 = vector.load %arg1[%c8, %c0_27, %c0_28] : memref<9x8x8xf32, #tpu.memory_space<vmem>>, vector<1x8x8xf32>
    %44 = vector.shape_cast %43 : vector<1x8x8xf32> to vector<8x8xf32>
    %cst_29 = arith.constant dense<0.000000e+00> : vector<8x256xf32>
    %45 = tpu.matmul %44, %42, %cst_29 {dimension_numbers = #tpu.dot_dimension_numbers<[1], [0], [0], [1], [0, 0, 1, 1], [], []>} : vector<8x8xf32>, vector<8x256xf32>, vector<8x256xf32> -> vector<8x256xf32>
    %46 = arith.addf %41, %45 : vector<8x256xf32>
    %c0_30 = arith.constant 0 : index
    %c0_31 = arith.constant 0 : index
    %47 = vector.load %arg2[%c0_30, %c0_31] : memref<8x1xf32, #tpu.memory_space<vmem>>, vector<8x1xf32>
    %48 = vector.broadcast %47 : vector<8x1xf32> to vector<8x256xf32>
    %49 = arith.addf %46, %48 : vector<8x256xf32>
    %c0_32 = arith.constant 0 : index
    %c0_33 = arith.constant 0 : index
    %50 = vector.load %arg5[%c0_32, %c0_33] : memref<8x256xf32, #tpu.memory_space<vmem>>, vector<8x256xf32>
    tpu.vector_store %arg5[%c0_32, %c0_33], %49 {strides = array<i32>} : memref<8x256xf32, #tpu.memory_space<vmem>>, vector<8x256xf32>,
    return
  }
  func.func @transform_0(%arg0: i32) -> (i32, i32, i32) {
    %c0_i32 = arith.constant 0 : i32
    %c0_i32_0 = arith.constant 0 : i32
    %c0_i32_1 = arith.constant 0 : i32
    %c0_i32_2 = arith.constant 0 : i32
    return %c0_i32, %c0_i32_0, %c0_i32_1 : i32, i32, i32
  }
  func.func @transform_1(%arg0: i32) -> (i32, i32) {
    %c0_i32 = arith.constant 0 : i32
    %c0_i32_0 = arith.constant 0 : i32
    %c0_i32_1 = arith.constant 0 : i32
    return %c0_i32, %c0_i32_0 : i32, i32
  }
  func.func @transform_2(%arg0: i32) -> (i32, i32) {
    %c0_i32 = arith.constant 0 : i32
    %c0_i32_0 = arith.constant 0 : i32
    return %c0_i32, %arg0 : i32, i32
  }
  func.func @transform_3(%arg0: i32) -> (i32, i32) {
    %c1_i32 = arith.constant 1 : i32
    %0 = arith.addi %arg0, %c1_i32 : i32
    %c2_i32 = arith.constant 2 : i32
    %1 = arith.muli %0, %c2_i32 : i32
    %c0_i32 = arith.constant 0 : i32
    %c0_i32_0 = arith.constant 0 : i32
    return %c0_i32, %1 : i32, i32
  }
  func.func @transform_4(%arg0: i32) -> (i32, i32) {
    %c0_i32 = arith.constant 0 : i32
    %c0_i32_0 = arith.constant 0 : i32
    return %c0_i32, %arg0 : i32, i32
  }
}

</mosaic_0001>

<bundles_post_ra>
// kernel: tpu_custom_call.1
= control target key start
LH: loop header
LB: loop body
LE: loop exit
PB: predicated region body
PF: predicated region fallthrough
CT: control target
= control target key end

     0   :  { %9 = vsyncpa [#allocation3], 0  ;;  %s1554_s0 = inlined_call_operand.vmem [shape: f32[9,8,8], index: 0, kind: input, shape index: {}]   ;;  %s1555_s1 = inlined_call_operand.vmem [shape: f32[8,1], index: 1, kind: input, shape index: {}]   ;;  %s1556_s2 = inlined_call_operand.hbm [shape: f32[8,2688], index: 2, kind: input, shape index: {}]   ;;  %s1557_s3 = inlined_call_operand.hbm [shape: f32[8,2688], index: 3, kind: input, shape index: {}]   ;;  %s1558_s4 = inlined_call_operand.hbm [shape: f32[8,2560], index: 4, kind: output, shape index: {}]  }
   0x1   :  { %11 = vsyncpa [#allocation3 + $0x1], 0 }
   0x2   :  { %12 = vsyncpa [#allocation6], 0 }
   0x3   :  { %14 = vsyncpa [#allocation6 + $0x1], 0 }
   0x4   :  { %15 = vsyncpa [#allocation4], 0 }
   0x5   :  { %17 = vsyncpa [#allocation4 + $0x1], 0  ;;  %s1282_s15 = smov 0   ;;  %s1284_s16 = smov 0  }
   0x6   :  { %s1286_s17 = smov 0   ;;  %s1288_s18 = smov 0  }
   0x7   :  { %s1290_s19 = smov 0   ;;  %s1292_s20 = smov 0  }
   0x8   :  { %s1294_s21 = smov 0  }
   0x9 LB: > { %1566 = sst [smem:[#allocation11_spill]] %s1233_s18  ;;  %s1316_s22 = sadd.s32 4294967295, %s1245_s21   ;;  %s1245_s21 = sphi %s1294_s21, %s1584_s21   ;;  %s1241_s20 = sphi %s1292_s20, %s1587_s20   ;;  %s1237_s19 = sphi %s1290_s19, %s1592_s19   ;;  %s1233_s18 = sphi %s1288_s18, %s1591_s18   ;;  %s1229_s17 = sphi %s1286_s17, %s1590_s17   ;;  %s1225_s16 = sphi %s1284_s16, %s1589_s16   ;;  %s1221_s15 = sphi %s1282_s15, %s1588_s15  }
   0xa   : > { %1567 = sst [smem:[#allocation12_spill]] %s1241_s20  ;;  %s910_s23 = sadd.s32 4294967294, %s1245_s21  }
   0xb   : > { %s1320_s24 = sadd.s32 1, %s1245_s21   ;;  %s72_s25 = sadd.s32 1, %s1241_s20 }
   0xc   : > { %1568 = sst [smem:[#allocation13_spill]] %s1320_s24  ;;  %s69_s26 = ssub.s32 %s1245_s21, %s1320_s24 }
   0xd   : > { %p79_p0 = scmp.ne.s32.totalorder %s1241_s20, %s1237_s19  ;;  %p70_p1 = scmp.eq.s32.totalorder %s69_s26, 0 }
   0xe   : > { %p80_p2 = scmp.eq.s32.totalorder %s1245_s21, 0  ;;  %p85_p3 = scmp.ne.s32.totalorder %s1237_s19, %s1233_s18 }
   0xf   : > { %p86_p4 = scmp.eq.s32.totalorder %s1316_s22, 0  ;;  %s959_s30 = sshll.u32 %s1245_s21, 1 }
  0x10   : > { %s1332_s27 = scalar_select %p70_p1, %s1241_s20, %s72_s25  }
  0x11   : > { %p1339_p5 = por %p80_p2, %p79_p0  ;;  %p1348_p6 = por %p86_p4, %p85_p3 }
  0x12   : > { %1569 = sst [smem:[#allocation14_spill]] %s1332_s27  ;;  %s102_s5 = sadd.s32 1, %s1229_s17 }
  0x13   : > { %s960_s6 = sadd.s32 2, %s959_s30  ;;  %p109_p7 = scmp.ne.s32.totalorder %s1229_s17, %s1225_s16 }
  0x14   : > { %s962_s7 = sadd.s32 2, %s960_s6  ;;  %p115_p8 = scmp.ne.s32.totalorder %s1225_s16, %s1221_s15 }
  0x15   : > { %s99_s8 = ssub.s32 %s960_s6, %s962_s7  ;;  %p1359_p9 = por %p109_p7, %p80_p2 }
  0x16   : > { %p100_p10 = scmp.eq.s32.totalorder %s99_s8, 0  ;;  %p1365_p11 = por %p115_p8, %p86_p4 }
  0x17   : > { %p139_p12 = scmp.eq.s32.totalorder %s1316_s22, 9  ;;  %p145_p13 = scmp.eq.s32.totalorder %s910_s23, 9 }
  0x18   : > { %s1371_s11 = scalar_select %p100_p10, %s1229_s17, %s102_s5  }
  0x19   : > { %p1376_p1 = por %p139_p12, %p79_p0  ;;  %p1383_p2 = por %p145_p13, %p85_p3 }
  0x1a   : > { %1574 = sst [smem:[#allocation15_spill]] %s1371_s11  ;;  %p914_p7 = scmp.ge.s32.totalorder %s1245_s21, 10 }
  0x1b   : > { %s1575_s12 = scalar_select %p1376_p1, 1, 0 }
  0x1c   : > { %s1576_s13 = scalar_select %p1383_p2, 1, 0 }
  0x1d   : > { %167 = sbr.rel (%p914_p7) target bundleno = 86 (0x56), region = 24 }
  0x1e   : > { %1577 = sst [smem:[#allocation16_spill]] %s1576_s13 }
  0x22   : > { %170 = sbr.rel (!%p1339_p5) target bundleno = 70 (0x46), region = 28  ;;  %s171_s14 = sand.u32 (%p1339_p5), 1, %s1241_s20  }
  0x23   : > { %s177_s15 = ssub.s32 (%p1339_p5), 21, %s959_s30  ;;  %s915_s23 = sshll.u32 (%p1339_p5), %s171_s14, 4 }
  0x24   : > { %p178_p4 = scmp.lt.s32.totalorder (%p1339_p5), %s177_s15, 2  ;;  %s1394_s6 = scalar_lea.sflag (%p1339_p5), [#allocation3], %s171_s14 }
  0x25   : > { %s175_s7 = scalar_lea.vmem (%p1339_p5), [#allocation2], %s915_s23 }
  0x27   : > { %s1594_s15 = smov (!%p178_p4, %s177_s15), 2 }
  0x28   : > { %s917_s25 = sshll.u32 %s1594_s15, 3 }
  0x29   : > { %s181_s26 = ssub.s32 16, %s917_s25 }
  0x2a   : > { %s182_s5 = sshll.u32 %s181_s26, 4 }
  0x2b   : > { %183 = vsyncadd %s1394_s6, %s182_s5  ;;  %p1397_p0 = scmp.ne.s32.totalorder %s917_s25, 0  ;;  %s963_s30 = sshll.u32 %s1245_s21, 4 }
  0x2c   : > { %s186_s20 = scalar_lea.hbm %s1556_s2, %s963_s30  ;;  %s1563_s11 = sshll.u32 %s1594_s15, 7 }
  0x2d   : > { %s189_s26 = sshll.u32 %s186_s20, 4  ;;  %s1406_s14 = sshll.u32 %s175_s7, 4  ;;  %s190_s26 = int_to_ptr.hbm [resolvable:$true] %s189_s26  ;;  %s192_s14 = int_to_ptr.vmem [resolvable:$true] %s1406_s14 }
  0x2e   : > { %s1084_s23 = sshra.s32 %s190_s26, 4  ;;  %s1086_s25 = sshrl.u32 %s1563_s11, 4  ;;  %s1085_s23 = int_to_ptr.hbm [resolvable:$true] %s1084_s23 }
  0x2f   : > { %s1091_s5 = scalar_lea.hbm %s1085_s23, %s1086_s25  ;;  %s1095_s27 = scalar_lea.hbm %s1556_s2, 168 }
  0x30   : > { %p1092_p3 = scmp.ne.s32.totalorder %s1085_s23, %s1091_s5  ;;  %p1096_p10 = scmp.lt.s32.totalorder %s1085_s23, %s1556_s2 }
  0x31   : > { %p1097_p12 = scmp.lt.s32.totalorder %s1095_s27, %s1091_s5 }
  0x32   : > { %p1093_p5 = pnand %p1092_p3, %p1397_p0 }
  0x33   : > { %p1098_p13 = por %p1097_p12, %p1096_p10 }
  0x34   : > { %p1094_p8 = pneg %p1093_p5 }
  0x36   : > { %p1099_p7 = pnand %p1098_p13, %p1094_p8 }
  0x38   : > { %1102 = shalt.err (!%p1099_p7)
}
  0x39   : > { %s1103_s7 = sshra.s32 %s192_s14, 4  ;;  %s1247_s11 = smov [#allocation2]   ;;  %s1104_s7 = int_to_ptr.vmem [resolvable:$true] %s1103_s7 }
  0x3a   : > { %s1110_s8 = scalar_lea.vmem %s1104_s7, %s1086_s25  ;;  %s1114_s18 = scalar_lea.vmem %s1247_s11, 32 }
  0x3b   : > { %p1111_p4 = scmp.ne.s32.totalorder %s1104_s7, %s1110_s8  ;;  %p1116_p2 = scmp.lt.s32.totalorder %s1114_s18, %s1110_s8 }
  0x3d   : > { %p1112_p3 = pnand %p1111_p4, %p1397_p0 }
  0x3f   : > { %p1113_p5 = pneg %p1112_p3 }
  0x41   : > { %p1118_p1 = pnand %p1116_p2, %p1113_p5 }
  0x43   : > { %1121 = shalt.err (!%p1118_p1)
}
  0x44   : > { %s1579_s24 = sshll.u32 %s1594_s15, 7 }
  0x45   : > { %194 = dma.hbm_to_vmem [thread:$0]  (%p1397_p0), %s190_s26, %s1579_s24, %s192_s14, %s1394_s6  }
  0x46 PF: > { %s198_s13 = sand.u32 1, %s1229_s17   ;;  %s923_s23 = sshll.u32 %s1245_s21, 4 }
  0x47   : > { %s922_s25 = sshll.u32 %s198_s13, 3  ;;  %s852_s11 = scalar_lea.hbm %s1557_s3, %s923_s23 }
  0x48   : > { %s853_s18 = scalar_lea.hbm %s852_s11, 16  ;;  %s202_s30 = scalar_lea.vmem [#allocation5], %s922_s25 }
  0x49   : > { %s212_s20 = sshll.u32 %s202_s30, 4  ;;  %s210_s7 = sshll.u32 %s853_s18, 4  ;;  %s213_s20 = int_to_ptr.vmem [resolvable:$true] %s212_s20  ;;  %s211_s7 = int_to_ptr.hbm [resolvable:$true] %s210_s7 }
  0x4a   : > { %s199_s28 = scalar_lea.sflag [#allocation6], %s198_s13  ;;  %s1123_s15 = sshra.s32 %s211_s7, 4  ;;  %s1124_s15 = int_to_ptr.hbm [resolvable:$true] %s1123_s15 }
  0x4b   : > { %s1125_s6 = scalar_lea.hbm %s1124_s15, 8  ;;  %s1129_s8 = scalar_lea.hbm %s1557_s3, 168 }
  0x4c   : > { %p1126_p1 = scmp.ne.s32.totalorder %s1124_s15, %s1125_s6  ;;  %p1130_p8 = scmp.lt.s32.totalorder %s1124_s15, %s1557_s3 }
  0x4d   : > { %p1131_p10 = scmp.lt.s32.totalorder %s1129_s8, %s1125_s6 }
  0x4e   : > { %p1127_p2 = pnand %p1126_p1, %p1359_p9 }
  0x4f   : > { %p1132_p12 = por %p1131_p10, %p1130_p8 }
  0x50   : > { %p1128_p0 = pneg %p1127_p2 }
  0x52   : > { %p1133_p13 = pnand %p1132_p12, %p1128_p0 }
  0x54   : > { %1136 = shalt.err (!%p1133_p13)
}
  0x55   : > { %967 = dma.hbm_to_vmem [thread:$0]  (%p1359_p9), %s211_s7, 128, %s213_s20, %s199_s28  }
  0x56 PF: > { %p924_p7 = scmp.ge.s32.totalorder %s1245_s21, 1  ;;  %p217_p4 = scmp.lt.s32.totalorder %s1245_s21, 11 }
  0x58   : > { %p218_p3 = pnand %p924_p7, %p217_p4 }
  0x59   : > { %s1444_s13 = sand.u32 (!%p218_p3), 1, %s1237_s19  }
  0x5a   : > { %221 = sbr.rel (%p218_p3) target bundleno = 396 (0x18c), region = 36  ;;  %s925_s25 = sshll.u32 (!%p218_p3), %s1444_s13, 4 }
  0x5b   : > { %s224_s5 = scalar_lea.sflag (!%p218_p3), [#allocation3], %s1444_s13  ;;  %s227_s27 = scalar_lea.vmem (!%p218_p3), [#allocation2], %s925_s25 }
  0x5f   : > { %1208 = dma.done.wait (%p1348_p6), %s224_s5, 256  }
  0x60   : > { %1210 = vsyncadd (%p1348_p6), %s224_s5, 4294967040  ;;  %s233_s9 = sand.u32 1, %s1225_s16  }
  0x61   : > { %s926_s11 = sshll.u32 %s233_s9, 3  ;;  %s234_s18 = scalar_lea.sflag [#allocation6], %s233_s9 }
  0x62   : > { %s237_s30 = scalar_lea.vmem [#allocation5], %s926_s11 }
  0x63   : > { %1212 = dma.done.wait (%p1365_p11), %s234_s18, 128  }
  0x64   : > { %1214 = vsyncadd (%p1365_p11), %s234_s18, 4294967168  ;;  %v276_v0 = vld [vmem:[%s227_s27] sm:$0xff]  ;;  %v277_v1 = vld [vmem:[%s227_s27 + $0x8] sm:$0xff]  ;;  %s1248_s20 = smov 126   ;;  %s1249_s29 = smov 127   ;;  %vm296_vm0 = vcmask 64512  }
  0x65   : > { %v1047_v2 = vpack.i.bf16 %v277_v1, %v276_v0  ;;  %358 = vmatpush.msra.mxu2 %v276_v0  ;;  %378 = vmatpush.msra.mxu3 %v277_v1  ;;  %s1250_s7 = smov 94   ;;  %v278_v3 = vld [vmem:[%s237_s30] sm:$0xff]  ;;  %s1251_s28 = smov 93   ;;  %vm449_vm1 = vcmask 769024   ;;  %v936_v8 = vld [vmem:[%s1554_s0 + $0x18] sm:$0xff]  ;;  %vm565_vm2 = vcmask 752640  }
  0x66   : > { %s1252_s10 = smov 92   ;;  %s1253_s15 = smov 60   ;;  %v279_v4 = vld [vmem:[%s1554_s0] sm:$0xff]  ;;  %v942_v15 = vld [vmem:[%s1554_s0 + $0x28] sm:$0xff]  ;;  %vm291_vm3 = vcmask 1039360   ;;  %vm391_vm4 = vcmask 1031168  }
  0x67   : > { %1048 = vrot.lane.b32.xlu1 %v1047_v2, %s1248_s20  ;;  %1043 = vrot.lane.b32.xlu0 %v1047_v2, %s1249_s29  ;;  %s1254_s6 = smov 59   ;;  %s1255_s26 = smov 58   ;;  %v928_v23 = vld [vmem:[%s1554_s0 + $0x8] sm:$0xff]  ;;  %v933_v30 = vld [vmem:[%s1554_s0 + $0x10] sm:$0xff]  ;;  %v1256_v33 = vmov 0   ;;  %vm507_vm5 = vcmask 760832  }
  0x68   : > { %1053 = vrot.lane.b32.xlu2 %v1047_v2, %s1250_s7  ;;  %931 = vmatmul.msk.f32.vlgmr.msra.gmra.mxu2 %vm296_vm0, %v279_v4  ;;  %v789_v31 = vld [vmem:[%s1555_s1] sm:$0xff]  ;;  %vm623_vm6 = vcmask 490496   ;;  %vm739_vm7 = vcmask 474112   ;;  %v945_v49 = vld [vmem:[%s1554_s0 + $0x30] sm:$0xff]  ;;  %vm681_vm8 = vcmask 482304   ;;  %v948_v57 = vld [vmem:[%s1554_s0 + $0x38] sm:$0xff] }
  0x69   : > { %932 = vmatmul.msk.f32.vlgmr.msra.gmra.mxu3 %vm296_vm0, %v279_v4  ;;  %1082 = vset.pattern.permute.xlu1 %v1256_v33  ;;  %v939_v38 = vld [vmem:[%s1554_s0 + $0x20] sm:$0xff]  ;;  %s964_s24 = sshll.u32 %s1316_s22, 4  ;;  %s267_s9 = scalar_lea.vmem [#allocation7], %s925_s25 }
  0x6a   : > { %1083 = vset.pattern.permute.xlu0 %v1256_v33  ;;  %v951_v60 = vld [vmem:[%s1554_s0 + $0x40] sm:$0xff]  ;;  %s811_s27 = scalar_lea.hbm %s1558_s4, %s964_s24  ;;  %s813_s22 = sshll.u32 %s267_s9, 4  ;;  %s814_s22 = int_to_ptr.vmem [resolvable:$true] %s813_s22 }
  0x6b   : > { %s815_s11 = sshll.u32 %s811_s27, 4  ;;  %s800_s18 = scalar_lea.sflag [#allocation4], %s1444_s13  ;;  %s816_s11 = int_to_ptr.hbm [resolvable:$true] %s815_s11 }
  0x6c   : > { %s1165_s30 = sshra.s32 %s816_s11, 4  ;;  %p1580_p9 = scmp.ne.s32.totalorder %s1575_s12, 0  ;;  %s1166_s30 = int_to_ptr.hbm [resolvable:$true] %s1165_s30 }
  0x6d   : > { %s1171_s25 = scalar_lea.hbm %s1558_s4, 160  ;;  %p1172_p1 = scmp.lt.s32.totalorder %s1166_s30, %s1558_s4 }
  0x6f   : > { %389 = vrot.lane.b32.xlu1 %v278_v3, %s1248_s20  ;;  %289 = vrot.lane.b32.xlu0 %v278_v3, %s1249_s29  ;;  %s1167_s20 = scalar_lea.hbm %s1166_s30, 16 }
  0x70   : > { %447 = vrot.lane.b32.xlu2 %v278_v3, %s1250_s7  ;;  %p1168_p6 = scmp.ne.s32.totalorder %s1166_s30, %s1167_s20  ;;  %p1173_p2 = scmp.lt.s32.totalorder %s1171_s25, %s1167_s20 }
  0x72   : > { %p1169_p11 = pnand %p1168_p6, %p1580_p9  ;;  %p1174_p0 = por %p1173_p2, %p1172_p1 }
  0x74   : > { %p1170_p5 = pneg %p1169_p11 }
  0x76   : > { %p1175_p8 = pnand %p1174_p0, %p1170_p5 }
  0x77   : > { %1058 = vrot.lane.b32.xlu0 %v1047_v2, %s1251_s28  ;;  %505 = vrot.lane.b32.xlu1 %v278_v3, %s1251_s28 }
  0x78   : > { %1063 = vrot.lane.b32.xlu2 %v1047_v2, %s1252_s10 }
  0x7f   : > { %563 = vrot.lane.b32.xlu0 %v278_v3, %s1252_s10  ;;  %1068 = vrot.lane.b32.xlu1 %v1047_v2, %s1253_s15 }
  0x80   : > { %621 = vrot.lane.b32.xlu2 %v278_v3, %s1253_s15 }
  0x87   : > { %1073 = vrot.lane.b32.xlu0 %v1047_v2, %s1254_s6  ;;  %679 = vrot.lane.b32.xlu1 %v278_v3, %s1254_s6 }
  0x88   : > { %1078 = vrot.lane.b32.xlu2 %v1047_v2, %s1255_s26 }
  0x8f   : > { %737 = vrot.lane.b32.xlu0 %v278_v3, %s1255_s26  ;;  %792 = vperm.xlu1 %1082, %v789_v31  }
  0xc2   : > { %v1054_v5 = vpop.permute.xlu2 %1053 }
  0xc3   : > { %v1056_v6 = vunpack.i.h.bf16 %v1054_v5  ;;  %v1055_v7 = vunpack.i.l.bf16 %v1054_v5 }
  0xc5   : > { %v450_v9 = vsel %vm449_vm1, %v1055_v7, %v1056_v6 }
  0xc6   : > { %472 = vmatpush.msrb.mxu2 %v450_v9 }
  0xc7   : > { %937 = vmatmul.msk.f32.vlgmr.msrb.gmra.mxu2 %vm296_vm0, %v936_v8 }
  0xca   : > { %v448_v10 = vpop.permute.xlu2 %447 }
  0xcb   : > { %v451_v11 = vsel %vm449_vm1, %v1056_v6, %v448_v10 }
  0xcc   : > { %492 = vmatpush.msrb.mxu3 %v451_v11 }
  0xcd   : > { %938 = vmatmul.msk.f32.vlgmr.msrb.gmra.mxu3 %vm296_vm0, %v936_v8 }
  0xd2   : > { %v1064_v12 = vpop.permute.xlu2 %1063 }
  0xd3   : > { %v1066_v13 = vunpack.i.h.bf16 %v1064_v12  ;;  %v1065_v14 = vunpack.i.l.bf16 %v1064_v12 }
  0xd5   : > { %v566_v16 = vsel %vm565_vm2, %v1065_v14, %v1066_v13 }
  0xd6   : > { %588 = vmatpush.msra.mxu2 %v566_v16 }
  0xd7   : > { %943 = vmatmul.msk.f32.vlgmr.msra.gmra.mxu2 %vm296_vm0, %v942_v15 }
  0xd9   : > { %v1049_v17 = vpop.permute.xlu1 %1048  ;;  %v1044_v18 = vpop.permute.xlu0 %1043 }
  0xda   : > { %v1051_v19 = vunpack.i.h.bf16 %v1049_v17  ;;  %v1050_v20 = vunpack.i.l.bf16 %v1049_v17  ;;  %v1046_v21 = vunpack.i.h.bf16 %v1044_v18  ;;  %v1045_v22 = vunpack.i.l.bf16 %v1044_v18  ;;  %v622_v32 = vpop.permute.xlu2 %621 }
  0xdc   : > { %v292_v24 = vsel %vm291_vm3, %v1045_v22, %v1046_v21  ;;  %v392_v25 = vsel %vm391_vm4, %v1050_v20, %v1051_v19 }
  0xdd   : > { %315 = vmatpush.msra.mxu0 %v292_v24 }
  0xde   : > { %929 = vmatmul.msk.f32.vlgmr.msra.gmra.mxu0 %vm296_vm0, %v928_v23 }
  0xdf   : > { %414 = vmatpush.msrb.mxu0 %v392_v25 }
  0xe1   : > { %v390_v26 = vpop.permute.xlu1 %389  ;;  %v290_v27 = vpop.permute.xlu0 %289 }
  0xe2   : > { %v293_v28 = vsel %vm291_vm3, %v1046_v21, %v290_v27  ;;  %v393_v29 = vsel %vm391_vm4, %v1051_v19, %v390_v26  ;;  %v1079_v41 = vpop.permute.xlu2 %1078 }
  0xe3   : > { %335 = vmatpush.msra.mxu1 %v293_v28  ;;  %v1081_v42 = vunpack.i.h.bf16 %v1079_v41  ;;  %v1080_v43 = vunpack.i.l.bf16 %v1079_v41 }
  0xe4   : > { %930 = vmatmul.msk.f32.vlgmr.msra.gmra.mxu1 %vm296_vm0, %v928_v23 }
  0xe5   : > { %434 = vmatpush.msrb.mxu1 %v393_v29  ;;  %v740_v52 = vsel %vm739_vm7, %v1080_v43, %v1081_v42 }
  0xe6   : > { %934 = vmatmul.msk.f32.vlgmr.msrb.gmra.mxu0 %vm296_vm0, %v933_v30 }
  0xe9   : > { %v1059_v34 = vpop.permute.xlu0 %1058  ;;  %v506_v35 = vpop.permute.xlu1 %505 }
  0xea   : > { %v1061_v36 = vunpack.i.h.bf16 %v1059_v34  ;;  %v1060_v37 = vunpack.i.l.bf16 %v1059_v34 }
  0xeb   : > { %v360_v2 = vpop.f32.mrf.mxu2 }
  0xec   : > { %v509_v39 = vsel %vm507_vm5, %v1061_v36, %v506_v35  ;;  %935 = vmatmul.msk.f32.vlgmr.msrb.gmra.mxu1 %vm296_vm0, %v933_v30  ;;  %v508_v40 = vsel %vm507_vm5, %v1060_v37, %v1061_v36  ;;  %v380_v3 = vpop.f32.mrf.mxu3 }
  0xed   : > { %530 = vmatpush.msra.mxu0 %v508_v40  ;;  %550 = vmatpush.msra.mxu1 %v509_v39 }
  0xee   : > { %940 = vmatmul.msk.f32.vlgmr.msra.gmra.mxu0 %vm296_vm0, %v939_v38 }
  0xf1   : > { %v564_v44 = vpop.permute.xlu0 %563  ;;  %v1069_v45 = vpop.permute.xlu1 %1068 }
  0xf2   : > { %v567_v46 = vsel %vm565_vm2, %v1066_v13, %v564_v44  ;;  %v1071_v47 = vunpack.i.h.bf16 %v1069_v45  ;;  %v1070_v48 = vunpack.i.l.bf16 %v1069_v45 }
  0xf3   : > { %608 = vmatpush.msra.mxu3 %v567_v46 }
  0xf4   : > { %941 = vmatmul.msk.f32.vlgmr.msra.gmra.mxu1 %vm296_vm0, %v939_v38  ;;  %944 = vmatmul.msk.f32.vlgmr.msra.gmra.mxu3 %vm296_vm0, %v942_v15  ;;  %v625_v50 = vsel %vm623_vm6, %v1071_v47, %v622_v32  ;;  %v624_v51 = vsel %vm623_vm6, %v1070_v48, %v1071_v47 }
  0xf5   : > { %646 = vmatpush.msrb.mxu0 %v624_v51  ;;  %666 = vmatpush.msrb.mxu1 %v625_v50 }
  0xf6   : > { %946 = vmatmul.msk.f32.vlgmr.msrb.gmra.mxu0 %vm296_vm0, %v945_v49 }
  0xf7   : > { %762 = vmatpush.msra.mxu0 %v740_v52 }
  0xf9   : > { %v1074_v53 = vpop.permute.xlu0 %1073  ;;  %v680_v54 = vpop.permute.xlu1 %679 }
  0xfa   : > { %v1076_v55 = vunpack.i.h.bf16 %v1074_v53  ;;  %v1075_v56 = vunpack.i.l.bf16 %v1074_v53 }
  0xfc   : > { %v683_v58 = vsel %vm681_vm8, %v1076_v55, %v680_v54  ;;  %947 = vmatmul.msk.f32.vlgmr.msrb.gmra.mxu1 %vm296_vm0, %v945_v49  ;;  %v682_v59 = vsel %vm681_vm8, %v1075_v56, %v1076_v55 }
  0xfd   : > { %704 = vmatpush.msrb.mxu2 %v682_v59  ;;  %724 = vmatpush.msrb.mxu3 %v683_v58 }
  0xfe   : > { %949 = vmatmul.msk.f32.vlgmr.msrb.gmra.mxu2 %vm296_vm0, %v948_v57  ;;  %950 = vmatmul.msk.f32.vlgmr.msrb.gmra.mxu3 %vm296_vm0, %v948_v57 }
  0xff   : > { %952 = vmatmul.msk.f32.vlgmr.msra.gmra.mxu0 %vm296_vm0, %v951_v60 }
 0x101   : > { %v738_v61 = vpop.permute.xlu0 %737  ;;  %v793_v31 = vpop.permute.xlu1 %792 }
 0x102   : > { %v741_v62 = vsel %vm739_vm7, %v1081_v42, %v738_v61 }
 0x103   : > { %782 = vmatpush.msra.mxu1 %v741_v62 }
 0x104   : > { %953 = vmatmul.msk.f32.vlgmr.msra.gmra.mxu1 %vm296_vm0, %v951_v60 }
 0x14a   : > { %v474_v6 = vpop.f32.mrf.mxu2 }
 0x150   : > { %v494_v8 = vpop.f32.mrf.mxu3 }
 0x15a   : > { %v590_v16 = vpop.f32.mrf.mxu2 }
 0x15b   : > { %v317_v63 = vpop.f32.mrf.mxu0 }
 0x15c   : > { %v361_v7 = vadd.f32 %v360_v2, %v317_v63 }
 0x161   : > { %v337_v0 = vpop.f32.mrf.mxu1 }
 0x162   : > { %v381_v10 = vadd.f32 %v380_v3, %v337_v0 }
 0x163   : > { %v416_v1 = vpop.f32.mrf.mxu0 }
 0x164   : > { %v439_v11 = vadd.f32 %v416_v1, %v361_v7 }
 0x166   : > { %v497_v13 = vadd.f32 %v474_v6, %v439_v11 }
 0x169   : > { %v436_v4 = vpop.f32.mrf.mxu1 }
 0x16a   : > { %v440_v12 = vadd.f32 %v436_v4, %v381_v10 }
 0x16b   : > { %v532_v5 = vpop.f32.mrf.mxu0 }
 0x16c   : > { %v498_v14 = vadd.f32 %v494_v8, %v440_v12  ;;  %v555_v18 = vadd.f32 %v532_v5, %v497_v13 }
 0x16e   : > { %v613_v22 = vadd.f32 %v590_v16, %v555_v18 }
 0x171   : > { %v552_v9 = vpop.f32.mrf.mxu1 }
 0x172   : > { %v556_v19 = vadd.f32 %v552_v9, %v498_v14 }
 0x173   : > { %v648_v15 = vpop.f32.mrf.mxu0 }
 0x174   : > { %v671_v23 = vadd.f32 %v648_v15, %v613_v22 }
 0x177   : > { %v610_v17 = vpop.f32.mrf.mxu3 }
 0x178   : > { %v614_v21 = vadd.f32 %v610_v17, %v556_v19 }
 0x179   : > { %v668_v20 = vpop.f32.mrf.mxu1 }
 0x17a   : > { %v672_v24 = vadd.f32 %v668_v20, %v614_v21 }
 0x17c   : > { %v764_v25 = vpop.f32.mrf.mxu0 }
 0x181   : > { %v706_v26 = vpop.f32.mrf.mxu2  ;;  %v726_v27 = vpop.f32.mrf.mxu3 }
 0x182   : > { %v729_v28 = vadd.f32 %v706_v26, %v671_v23  ;;  %v730_v29 = vadd.f32 %v726_v27, %v672_v24  ;;  %v784_v30 = vpop.f32.mrf.mxu1 }
 0x184   : > { %v787_v32 = vadd.f32 %v764_v25, %v729_v28  ;;  %v788_v33 = vadd.f32 %v784_v30, %v730_v29 }
 0x186   : > { %v795_v34 = vadd.f32 %v793_v31, %v787_v32  ;;  %v796_v35 = vadd.f32 %v793_v31, %v788_v33 }
 0x188   : > { %797 = vst [vmem:[%s267_s9] sm:$0xff] %v795_v34 }
 0x189   : > { %798 = vst [vmem:[%s267_s9 + $0x8] sm:$0xff] %v796_v35 }
 0x18a   : > { %1178 = shalt.err (!%p1175_p8)
}
 0x18b   : > { %970 = dma.vmem_to_hbm [thread:$0]  (%p1580_p9), %s814_s22, 256, %s816_s11, %s800_s18  }
 0x18c PF: > { %s1581_s13 = sld [smem:[#allocation11_spill]]  ;;  %p976_p10 = scmp.ge.s32.totalorder %s1245_s21, 2 }
 0x18d   : > { %s1582_s15 = sld [smem:[#allocation16_spill]] }
 0x192   : > { %s827_s6 = sand.u32 1, %s1581_s13  }
 0x193   : > { %p1583_p12 = scmp.ne.s32.totalorder %s1582_s15, 0  ;;  %s828_s26 = scalar_lea.sflag [#allocation4], %s827_s6 }
 0x195   : > { %p973_p13 = pnand %p976_p10, %p1583_p12 }
 0x197   : > { %p974_p7 = pneg %p973_p13 }
 0x199   : > { %1216 = dma.done.wait (%p974_p7), %s828_s26, 256  }
 0x19a   : > { %1218 = vsyncadd (%p974_p7), %s828_s26, 4294967040  ;;  %s1584_s21 = sld [smem:[#allocation13_spill]]  ;;  %s1588_s15 = smov %s1225_s16 }
 0x19b   : > { %s1585_s14 = sld [smem:[#allocation15_spill]]  ;;  %s1589_s16 = smov %s1229_s17 }
 0x19c   : > { %s1586_s8 = sld [smem:[#allocation12_spill]]  ;;  %s1591_s18 = smov %s1237_s19 }
 0x19d   : > { %s1587_s20 = sld [smem:[#allocation14_spill]] }
 0x1a0   : > { %p20_p4 = scmp.ge.s32.totalorder %s1584_s21, 12  }
 0x1a1   : > { %s1590_s17 = smov %s1585_s14 }
 0x1a2   : > { %s1592_s19 = smov %s1586_s8  ;;  %22 = sbr.rel (!%p20_p4) target bundleno = 9 (0x9), region = 102 }
 0x1a7   :  { %834 = vsyncpa [#allocation3], 1 }
 0x1a8   :  { %836 = vsyncpa [#allocation3 + $0x1], 1 }
 0x1a9   :  { %837 = vsyncpa [#allocation6], 1 }
 0x1aa   :  { %839 = vsyncpa [#allocation6 + $0x1], 1 }
 0x1ab   :  { %840 = vsyncpa [#allocation4], 1 }
 0x1ac   :  { %842 = vsyncpa [#allocation4 + $0x1], 1 }

</bundles_post_ra>
